<compile_context>
chip_gen: v7x
topology: tpu7x:2x2x1
jax: 0.10.0
libtpu: 0.0.40
codegen_flags: <defaults>
</compile_context>

<pallas_src>
import functools
import math

import jax
import jax.numpy as jnp
from jax.experimental import pallas as pl
from jax.experimental.pallas import tpu as pltpu


def mha_flash_kernel(q_ref, k_ref, v_ref, bias_ref, o_ref,
                     m_ref, l_ref, acc_ref, *, n_heads):
    ki = pl.program_id(2)

    @pl.when(ki == 0)
    def _():
        m_ref[...] = jnp.full_like(m_ref, -jnp.inf)
        l_ref[...] = jnp.zeros_like(l_ref)
        acc_ref[...] = jnp.zeros_like(acc_ref)

    q = q_ref[...]                       # (n_heads, tq, dph) bf16, already scaled
    k = k_ref[...]                       # (n_heads, tk, dph) bf16
    v = v_ref[...]                       # (n_heads, tk, dph) bf16 (v_lin is Identity)
    bias = bias_ref[...]                 # (1, tk) f32: 0 keep / -1e30 masked

    # Head-batched QK^T on the MXU, f32 accumulation; additive key-padding mask.
    s = jnp.einsum('hqd,hkd->hqk', q, k,
                   preferred_element_type=jnp.float32)          # (h, tq, tk) f32
    s = s + bias[jnp.newaxis]                                    # broadcast over heads/rows

    # Online (flash) softmax update.
    m_prev = m_ref[...]                                          # (h, tq, 1)
    m_new = jnp.maximum(m_prev, jnp.max(s, axis=-1, keepdims=True))
    alpha = jnp.exp(m_prev - m_new)
    p = jnp.exp(s - m_new)                                       # f32 numerator
    l_ref[...] = alpha * l_ref[...] + jnp.sum(p, axis=-1, keepdims=True)
    acc_ref[...] = alpha * acc_ref[...] + jnp.einsum(
        'hqk,hkd->hqd', p.astype(v.dtype), v,
        preferred_element_type=jnp.float32)                      # (h, tq, dph)
    m_ref[...] = m_new

    # TODO(synk): attention dropout (p=0.1) omitted — eval-mode semantics only.

    @pl.when(ki == pl.num_programs(2) - 1)
    def _():
        # Deferred normalization on the narrow accumulator (EUP reciprocal), then
        # unshape(): heads concatenated along the feature axis; out_lin is Identity.
        ctx = acc_ref[...] * pl.reciprocal(l_ref[...], approx=True)   # (h, tq, dph) f32
        o_ref[...] = jnp.concatenate(
            [ctx[h] for h in range(n_heads)], axis=-1).astype(o_ref.dtype)


def multi_head_attention(x, mask, wq, bq, wk, bk, n_heads):
    bs, qlen, dim = x.shape
    klen = qlen
    assert dim % n_heads == 0
    dph = dim // n_heads
    scale = 1.0 / math.sqrt(dph)

    # --- one-time wrapper-side (XLA) prep -------------------------------------------
    # Q/K projections computed exactly once (review: K was recomputed per q tile).
    q = (x @ wq.T + bq) * scale          # scale folded here, f32
    k = x @ wk.T + bk

    def to_heads_bf16(t):                # (bs, seq, dim) -> (bs, n_heads, seq, dph) bf16
        return t.reshape(bs, -1, n_heads, dph).transpose(0, 2, 1, 3).astype(jnp.bfloat16)

    qh = to_heads_bf16(q)
    kh = to_heads_bf16(k)
    vh = to_heads_bf16(x)                # v_lin is Identity (qkv_mha=False)

    # Additive key-padding mask: 0 where attended, -1e30 where masked (finite so fully
    # padded rows give a uniform distribution instead of NaN — documented deviation).
    bias = jnp.where(mask == 0, jnp.float32(-1e30), jnp.float32(0.0)).reshape(bs, 1, klen)

    # --- tiling ----------------------------------------------------------------------
    # TODO(synk): make tile choices generation-aware (tq up to 512 on v5e/v6e with a
    # larger vmem_limit; keep tq<=256 / tk<=512 on v7x) and add ragged last-tile support.
    tq = min(qlen, 256)
    tk = min(klen, 512)
    assert qlen % tq == 0 and klen % tk == 0, "seq len must be a multiple of the tiles"
    nq, nk = qlen // tq, klen // tk

    kernel = functools.partial(mha_flash_kernel, n_heads=n_heads)

    return pl.pallas_call(
        kernel,
        out_shape=jax.ShapeDtypeStruct((bs, qlen, dim), x.dtype),
        grid=(bs, nq, nk),
        in_specs=[
            pl.BlockSpec((pl.Squeezed(), n_heads, tq, dph),
                         lambda b, qi, ki: (b, 0, qi, 0)),          # q  (head-major bf16)
            pl.BlockSpec((pl.Squeezed(), n_heads, tk, dph),
                         lambda b, qi, ki: (b, 0, ki, 0)),          # k  (head-major bf16)
            pl.BlockSpec((pl.Squeezed(), n_heads, tk, dph),
                         lambda b, qi, ki: (b, 0, ki, 0)),          # v  (head-major bf16)
            pl.BlockSpec((pl.Squeezed(), 1, tk),
                         lambda b, qi, ki: (b, 0, ki)),             # additive mask (f32)
        ],
        out_specs=pl.BlockSpec((pl.Squeezed(), tq, dim),
                               lambda b, qi, ki: (b, qi, 0)),       # lane-dense output
        scratch_shapes=[
            pltpu.VMEM((n_heads, tq, 1), jnp.float32),              # running max m
            pltpu.VMEM((n_heads, tq, 1), jnp.float32),              # running sum l
            pltpu.VMEM((n_heads, tq, dph), jnp.float32),            # unnormalized context
        ],
        compiler_params=pltpu.CompilerParams(
            dimension_semantics=("parallel", "parallel", "arbitrary"),
            vmem_limit_bytes=64 * 1024 * 1024),
    )(qh, kh, vh, bias)


def reference(x, mask, wq, bq, wk, bk, n_heads):
    """Pure-JAX (f32) mirror of the PyTorch forward (eval mode, kv=None, qkv_mha=False)."""
    bs, qlen, dim = x.shape
    dph = dim // n_heads
    q = x @ wq.T + bq
    k = x @ wk.T + bk
    v = x

    def shape(t):
        return t.reshape(bs, qlen, n_heads, dph).transpose(0, 2, 1, 3)

    q = shape(q) / math.sqrt(dph)
    k = shape(k)
    v = shape(v)
    scores = jnp.einsum('bhqd,bhkd->bhqk', q, k)
    m = (mask == 0).reshape(bs, 1, 1, qlen)
    scores = jnp.where(m, -jnp.inf, scores)
    w = jax.nn.softmax(scores.astype(jnp.float32), axis=-1)
    ctx = jnp.einsum('bhqk,bhkd->bhqd', w, v)
    return ctx.transpose(0, 2, 1, 3).reshape(bs, qlen, dim)


if __name__ == "__main__":
    bs, qlen, dim, n_heads = 2, 8, 32, 4

    key = jax.random.PRNGKey(0)
    kx, kwq, kbq, kwk, kbk = jax.random.split(key, 5)

    # PyTorch nn.Linear default init: U(-1/sqrt(fan_in), 1/sqrt(fan_in))
    bound = 1.0 / math.sqrt(dim)
    wq = jax.random.uniform(kwq, (dim, dim), jnp.float32, -bound, bound)
    bq = jax.random.uniform(kbq, (dim,), jnp.float32, -bound, bound)
    wk = jax.random.uniform(kwk, (dim, dim), jnp.float32, -bound, bound)
    bk = jax.random.uniform(kbk, (dim,), jnp.float32, -bound, bound)

    x = jax.random.normal(kx, (bs, qlen, dim), jnp.float32)
    # padding mask: batch 0 fully visible, batch 1 has the last 3 keys masked out
    mask = jnp.ones((bs, qlen), jnp.float32).at[1, qlen - 3:].set(0.0)

    out = multi_head_attention(x, mask, wq, bq, wk, bk, n_heads)
    out = jax.block_until_ready(out)

    ref = reference(x, mask, wq, bq, wk, bk, n_heads)
    assert out.shape == (bs, qlen, dim)
    # tolerance accounts for bf16 MXU operands + approx reciprocal vs the f32 reference
    assert jnp.allclose(out, ref, atol=3e-2, rtol=3e-2), "mismatch vs reference"

    print("KERNEL_OK")
</pallas_src>

<mosaic_0001>
module attributes {stable_mosaic.version = 11 : i64} {
  func.func @mha_flash_kernel(%arg0: i32, %arg1: i32, %arg2: i32, %arg3: memref<1x4x8x8xbf16, #tpu.memory_space<vmem>>, %arg4: memref<1x4x8x8xbf16, #tpu.memory_space<vmem>>, %arg5: memref<1x4x8x8xbf16, #tpu.memory_space<vmem>>, %arg6: memref<1x1x8xf32, #tpu.memory_space<vmem>>, %arg7: memref<1x8x32xf32, #tpu.memory_space<vmem>>, %arg8: memref<4x8x1xf32, #tpu.memory_space<vmem>>, %arg9: memref<4x8x1xf32, #tpu.memory_space<vmem>>, %arg10: memref<4x8x8xf32, #tpu.memory_space<vmem>>) attributes {dimension_semantics = [#tpu.dimension_semantics<parallel>, #tpu.dimension_semantics<parallel>, #tpu.dimension_semantics<arbitrary>], iteration_bounds = array<i64: 2, 1, 1>, scalar_prefetch = 0 : i64, scratch_operands = 3 : i64, tpu.core_type = #tpu.core_type<tc>, window_params = [{transform_indices = @transform_0, window_bounds = array<i64: 1, 4, 8, 8>}, {transform_indices = @transform_1, window_bounds = array<i64: 1, 4, 8, 8>}, {transform_indices = @transform_2, window_bounds = array<i64: 1, 4, 8, 8>}, {transform_indices = @transform_3, window_bounds = array<i64: 1, 1, 8>}, {transform_indices = @transform_4, window_bounds = array<i64: 1, 8, 32>}]} {
    %c0_i32 = arith.constant 0 : i32
    %0 = arith.cmpi eq, %arg2, %c0_i32 : i32
    %1 = arith.extui %0 : i1 to i32
    %c0_i32_0 = arith.constant 0 : i32
    %2 = arith.cmpi ne, %1, %c0_i32_0 : i32
    scf.if %2 {
      %cst_38 = arith.constant 0xFF800000 : f32
      %41 = vector.broadcast %cst_38 : f32 to vector<4x8x1xf32>
      %c0_39 = arith.constant 0 : index
      %c0_40 = arith.constant 0 : index
      %c0_41 = arith.constant 0 : index
      %42 = vector.load %arg8[%c0_39, %c0_40, %c0_41] : memref<4x8x1xf32, #tpu.memory_space<vmem>>, vector<4x8x1xf32>
      tpu.vector_store %arg8[%c0_39, %c0_40, %c0_41], %41 {strides = array<i32>} : memref<4x8x1xf32, #tpu.memory_space<vmem>>, vector<4x8x1xf32>,
      %cst_42 = arith.constant 0.000000e+00 : f32
      %43 = vector.broadcast %cst_42 : f32 to vector<4x8x1xf32>
      %c0_43 = arith.constant 0 : index
      %c0_44 = arith.constant 0 : index
      %c0_45 = arith.constant 0 : index
      %44 = vector.load %arg9[%c0_43, %c0_44, %c0_45] : memref<4x8x1xf32, #tpu.memory_space<vmem>>, vector<4x8x1xf32>
      tpu.vector_store %arg9[%c0_43, %c0_44, %c0_45], %43 {strides = array<i32>} : memref<4x8x1xf32, #tpu.memory_space<vmem>>, vector<4x8x1xf32>,
      %cst_46 = arith.constant 0.000000e+00 : f32
      %45 = vector.broadcast %cst_46 : f32 to vector<4x8x8xf32>
      %c0_47 = arith.constant 0 : index
      %c0_48 = arith.constant 0 : index
      %c0_49 = arith.constant 0 : index
      %46 = vector.load %arg10[%c0_47, %c0_48, %c0_49] : memref<4x8x8xf32, #tpu.memory_space<vmem>>, vector<4x8x8xf32>
      tpu.vector_store %arg10[%c0_47, %c0_48, %c0_49], %45 {strides = array<i32>} : memref<4x8x8xf32, #tpu.memory_space<vmem>>, vector<4x8x8xf32>,
    } else {
    }
    %c0 = arith.constant 0 : index
    %c0_1 = arith.constant 0 : index
    %c0_2 = arith.constant 0 : index
    %c0_3 = arith.constant 0 : index
    %3 = vector.load %arg3[%c0, %c0_1, %c0_2, %c0_3] : memref<1x4x8x8xbf16, #tpu.memory_space<vmem>>, vector<1x4x8x8xbf16>
    %4 = vector.shape_cast %3 : vector<1x4x8x8xbf16> to vector<4x8x8xbf16>
    %c0_4 = arith.constant 0 : index
    %c0_5 = arith.constant 0 : index
    %c0_6 = arith.constant 0 : index
    %c0_7 = arith.constant 0 : index
    %5 = vector.load %arg4[%c0_4, %c0_5, %c0_6, %c0_7] : memref<1x4x8x8xbf16, #tpu.memory_space<vmem>>, vector<1x4x8x8xbf16>
    %6 = vector.shape_cast %5 : vector<1x4x8x8xbf16> to vector<4x8x8xbf16>
    %c0_8 = arith.constant 0 : index
    %c0_9 = arith.constant 0 : index
    %c0_10 = arith.constant 0 : index
    %c0_11 = arith.constant 0 : index
    %7 = vector.load %arg5[%c0_8, %c0_9, %c0_10, %c0_11] : memref<1x4x8x8xbf16, #tpu.memory_space<vmem>>, vector<1x4x8x8xbf16>
    %8 = vector.shape_cast %7 : vector<1x4x8x8xbf16> to vector<4x8x8xbf16>
    %c0_12 = arith.constant 0 : index
    %c0_13 = arith.constant 0 : index
    %c0_14 = arith.constant 0 : index
    %9 = vector.load %arg6[%c0_12, %c0_13, %c0_14] : memref<1x1x8xf32, #tpu.memory_space<vmem>>, vector<1x1x8xf32>
    %10 = vector.shape_cast %9 : vector<1x1x8xf32> to vector<1x8xf32>
    "tpu.trace_start"() <{level = 10 : i32, message = "hqd,hkd->hqk"}> : () -> ()
    %cst = arith.constant dense<0.000000e+00> : vector<4x8x8xf32>
    %11 = tpu.matmul %4, %6, %cst {dimension_numbers = #tpu.dot_dimension_numbers<[2], [2], [1], [1], [0, 0, 0, 1, 1, 1], [0], [0]>} : vector<4x8x8xbf16>, vector<4x8x8xbf16>, vector<4x8x8xf32> -> vector<4x8x8xf32>
    "tpu.trace_stop"() : () -> ()
    %12 = vector.shape_cast %10 : vector<1x8xf32> to vector<1x1x8xf32>
    %13 = vector.broadcast %12 : vector<1x1x8xf32> to vector<4x8x8xf32>
    %14 = arith.addf %11, %13 : vector<4x8x8xf32>
    %c0_15 = arith.constant 0 : index
    %c0_16 = arith.constant 0 : index
    %c0_17 = arith.constant 0 : index
    %15 = vector.load %arg8[%c0_15, %c0_16, %c0_17] : memref<4x8x1xf32, #tpu.memory_space<vmem>>, vector<4x8x1xf32>
    %cst_18 = arith.constant dense<0xFF800000> : vector<4x8xf32>
    %16 = vector.multi_reduction <maximumf>, %14, %cst_18 [2] : vector<4x8x8xf32> to vector<4x8xf32>
    %17 = vector.shape_cast %16 : vector<4x8xf32> to vector<4x8x1xf32>
    %18 = arith.maximumf %15, %17 : vector<4x8x1xf32>
    %19 = arith.subf %15, %18 : vector<4x8x1xf32>
    %20 = math.exp %19 : vector<4x8x1xf32>
    %21 = vector.broadcast %18 : vector<4x8x1xf32> to vector<4x8x8xf32>
    %22 = arith.subf %14, %21 : vector<4x8x8xf32>
    %23 = math.exp %22 : vector<4x8x8xf32>
    %c0_19 = arith.constant 0 : index
    %c0_20 = arith.constant 0 : index
    %c0_21 = arith.constant 0 : index
    %24 = vector.load %arg9[%c0_19, %c0_20, %c0_21] : memref<4x8x1xf32, #tpu.memory_space<vmem>>, vector<4x8x1xf32>
    %25 = arith.mulf %20, %24 : vector<4x8x1xf32>
    %cst_22 = arith.constant dense<0.000000e+00> : vector<4x8xf32>
    %26 = vector.multi_reduction <add>, %23, %cst_22 [2] : vector<4x8x8xf32> to vector<4x8xf32>
    %27 = vector.shape_cast %26 : vector<4x8xf32> to vector<4x8x1xf32>
    %28 = arith.addf %25, %27 : vector<4x8x1xf32>
    %c0_23 = arith.constant 0 : index
    %c0_24 = arith.constant 0 : index
    %c0_25 = arith.constant 0 : index
    %29 = vector.load %arg9[%c0_23, %c0_24, %c0_25] : memref<4x8x1xf32, #tpu.memory_space<vmem>>, vector<4x8x1xf32>
    tpu.vector_store %arg9[%c0_23, %c0_24, %c0_25], %28 {strides = array<i32>} : memref<4x8x1xf32, #tpu.memory_space<vmem>>, vector<4x8x1xf32>,
    %c0_26 = arith.constant 0 : index
    %c0_27 = arith.constant 0 : index
    %c0_28 = arith.constant 0 : index
    %30 = vector.load %arg10[%c0_26, %c0_27, %c0_28] : memref<4x8x8xf32, #tpu.memory_space<vmem>>, vector<4x8x8xf32>
    %31 = vector.broadcast %20 : vector<4x8x1xf32> to vector<4x8x8xf32>
    %32 = arith.mulf %31, %30 : vector<4x8x8xf32>
    %33 = arith.truncf %23 : vector<4x8x8xf32> to vector<4x8x8xbf16>
    "tpu.trace_start"() <{level = 10 : i32, message = "hqk,hkd->hqd"}> : () -> ()
    %cst_29 = arith.constant dense<0.000000e+00> : vector<4x8x8xf32>
    %34 = tpu.matmul %33, %8, %cst_29 {dimension_numbers = #tpu.dot_dimension_numbers<[2], [1], [1], [2], [0, 0, 0, 1, 1, 2], [0], [0]>} : vector<4x8x8xbf16>, vector<4x8x8xbf16>, vector<4x8x8xf32> -> vector<4x8x8xf32>
    "tpu.trace_stop"() : () -> ()
    %35 = arith.addf %32, %34 : vector<4x8x8xf32>
    %c0_30 = arith.constant 0 : index
    %c0_31 = arith.constant 0 : index
    %c0_32 = arith.constant 0 : index
    %36 = vector.load %arg10[%c0_30, %c0_31, %c0_32] : memref<4x8x8xf32, #tpu.memory_space<vmem>>, vector<4x8x8xf32>
    tpu.vector_store %arg10[%c0_30, %c0_31, %c0_32], %35 {strides = array<i32>} : memref<4x8x8xf32, #tpu.memory_space<vmem>>, vector<4x8x8xf32>,
    %c0_33 = arith.constant 0 : index
    %c0_34 = arith.constant 0 : index
    %c0_35 = arith.constant 0 : index
    %37 = vector.load %arg8[%c0_33, %c0_34, %c0_35] : memref<4x8x1xf32, #tpu.memory_space<vmem>>, vector<4x8x1xf32>
    tpu.vector_store %arg8[%c0_33, %c0_34, %c0_35], %18 {strides = array<i32>} : memref<4x8x1xf32, #tpu.memory_space<vmem>>, vector<4x8x1xf32>,
    %c0_i32_36 = arith.constant 0 : i32
    %38 = arith.cmpi eq, %arg2, %c0_i32_36 : i32
    %39 = arith.extui %38 : i1 to i32
    %c0_i32_37 = arith.constant 0 : i32
    %40 = arith.cmpi ne, %39, %c0_i32_37 : i32
    scf.if %40 {
      %c0_38 = arith.constant 0 : index
      %c0_39 = arith.constant 0 : index
      %c0_40 = arith.constant 0 : index
      %41 = vector.load %arg10[%c0_38, %c0_39, %c0_40] : memref<4x8x8xf32, #tpu.memory_space<vmem>>, vector<4x8x8xf32>
      %c0_41 = arith.constant 0 : index
      %c0_42 = arith.constant 0 : index
      %c0_43 = arith.constant 0 : index
      %42 = vector.load %arg9[%c0_41, %c0_42, %c0_43] : memref<4x8x1xf32, #tpu.memory_space<vmem>>, vector<4x8x1xf32>
      %43 = tpu.reciprocal %42 {approx = true} : vector<4x8x1xf32> -> vector<4x8x1xf32>
      %44 = vector.broadcast %43 : vector<4x8x1xf32> to vector<4x8x8xf32>
      %45 = arith.mulf %41, %44 : vector<4x8x8xf32>
      %46 = vector.extract_strided_slice %45 {offsets = [0, 0, 0], sizes = [1, 8, 8], strides = [1, 1, 1]} : vector<4x8x8xf32> to vector<1x8x8xf32>
      %47 = vector.shape_cast %46 : vector<1x8x8xf32> to vector<8x8xf32>
      %48 = vector.extract_strided_slice %45 {offsets = [1, 0, 0], sizes = [1, 8, 8], strides = [1, 1, 1]} : vector<4x8x8xf32> to vector<1x8x8xf32>
      %49 = vector.shape_cast %48 : vector<1x8x8xf32> to vector<8x8xf32>
      %50 = vector.extract_strided_slice %45 {offsets = [2, 0, 0], sizes = [1, 8, 8], strides = [1, 1, 1]} : vector<4x8x8xf32> to vector<1x8x8xf32>
      %51 = vector.shape_cast %50 : vector<1x8x8xf32> to vector<8x8xf32>
      %52 = vector.extract_strided_slice %45 {offsets = [3, 0, 0], sizes = [1, 8, 8], strides = [1, 1, 1]} : vector<4x8x8xf32> to vector<1x8x8xf32>
      %53 = vector.shape_cast %52 : vector<1x8x8xf32> to vector<8x8xf32>
      %54 = tpu.concatenate %47, %49, %51, %53 in 1 : vector<8x8xf32>, vector<8x8xf32>, vector<8x8xf32>, vector<8x8xf32> -> vector<8x32xf32>
      %c0_44 = arith.constant 0 : index
      %c0_45 = arith.constant 0 : index
      %c0_46 = arith.constant 0 : index
      %55 = vector.load %arg7[%c0_44, %c0_45, %c0_46] : memref<1x8x32xf32, #tpu.memory_space<vmem>>, vector<1x8x32xf32>
      %56 = vector.shape_cast %55 : vector<1x8x32xf32> to vector<8x32xf32>
      %57 = vector.shape_cast %54 : vector<8x32xf32> to vector<1x8x32xf32>
      tpu.vector_store %arg7[%c0_44, %c0_45, %c0_46], %57 {strides = array<i32>} : memref<1x8x32xf32, #tpu.memory_space<vmem>>, vector<1x8x32xf32>,
    } else {
    }
    return
  }
  func.func @transform_0(%arg0: i32, %arg1: i32, %arg2: i32) -> (i32, i32, i32, i32) {
    %c0_i32 = arith.constant 0 : i32
    %c0_i32_0 = arith.constant 0 : i32
    %c0_i32_1 = arith.constant 0 : i32
    return %arg0, %c0_i32, %arg1, %c0_i32_0 : i32, i32, i32, i32
  }
  func.func @transform_1(%arg0: i32, %arg1: i32, %arg2: i32) -> (i32, i32, i32, i32) {
    %c0_i32 = arith.constant 0 : i32
    %c0_i32_0 = arith.constant 0 : i32
    %c0_i32_1 = arith.constant 0 : i32
    return %arg0, %c0_i32, %arg2, %c0_i32_0 : i32, i32, i32, i32
  }
  func.func @transform_2(%arg0: i32, %arg1: i32, %arg2: i32) -> (i32, i32, i32, i32) {
    %c0_i32 = arith.constant 0 : i32
    %c0_i32_0 = arith.constant 0 : i32
    %c0_i32_1 = arith.constant 0 : i32
    return %arg0, %c0_i32, %arg2, %c0_i32_0 : i32, i32, i32, i32
  }
  func.func @transform_3(%arg0: i32, %arg1: i32, %arg2: i32) -> (i32, i32, i32) {
    %c0_i32 = arith.constant 0 : i32
    %c0_i32_0 = arith.constant 0 : i32
    return %arg0, %c0_i32, %arg2 : i32, i32, i32
  }
  func.func @transform_4(%arg0: i32, %arg1: i32, %arg2: i32) -> (i32, i32, i32) {
    %c0_i32 = arith.constant 0 : i32
    %c0_i32_0 = arith.constant 0 : i32
    return %arg0, %arg1, %c0_i32 : i32, i32, i32
  }
}

</mosaic_0001>

<bundles_post_ra>
// kernel: tpu_custom_call.1
= control target key start
LH: loop header
LB: loop body
LE: loop exit
PB: predicated region body
PF: predicated region fallthrough
CT: control target
= control target key end

     0   :  { %s2034_s0 = inlined_call_operand.hbm [shape: bf16[2,4,8,8], index: 0, kind: input, shape index: {}]   ;;  %s2035_s1 = inlined_call_operand.hbm [shape: bf16[2,4,8,8], index: 1, kind: input, shape index: {}]   ;;  %s2036_s2 = inlined_call_operand.hbm [shape: bf16[2,4,8,8], index: 2, kind: input, shape index: {}]   ;;  %s2037_s3 = inlined_call_operand.hbm [shape: f32[2,1,8], index: 3, kind: input, shape index: {}]   ;;  %s2038_s4 = inlined_call_operand.hbm [shape: f32[2,8,32], index: 4, kind: output, shape index: {}]  }
   0x1   :  { %2051 = sst [smem:[#allocation23_spill]] %s2035_s1 }
   0x2   :  { %9 = vsyncpa [#allocation6], 0 }
   0x3   :  { %11 = vsyncpa [#allocation6 + $0x1], 0 }
   0x4   :  { %12 = vsyncpa [#allocation9], 0 }
   0x5   :  { %14 = vsyncpa [#allocation9 + $0x1], 0 }
   0x6   :  { %15 = vsyncpa [#allocation12], 0 }
   0x7   :  { %17 = vsyncpa [#allocation12 + $0x1], 0 }
   0x8   :  { %18 = vsyncpa [#allocation7], 0 }
   0x9   :  { %20 = vsyncpa [#allocation7 + $0x1], 0  ;;  %s1592_s15 = smov 0   ;;  %s1594_s16 = smov 0  }
   0xa   :  { %s1596_s17 = smov 0   ;;  %s1598_s18 = smov 0  }
   0xb   :  { %s1600_s19 = smov 0   ;;  %s1602_s20 = smov 0  }
   0xc LB: > { %2052 = sst [smem:[#allocation18_spill]] %s1539_s17  ;;  %s1623_s21 = sadd.s32 4294967295, %s1551_s20   ;;  %s1551_s20 = sphi %s1602_s20, %s26_s20   ;;  %s1547_s19 = sphi %s1600_s19, %s2083_s19   ;;  %s1543_s18 = sphi %s1598_s18, %s2082_s18   ;;  %s1539_s17 = sphi %s1596_s17, %s2078_s17   ;;  %s1535_s16 = sphi %s1594_s16, %s2081_s16   ;;  %s1531_s15 = sphi %s1592_s15, %s2080_s15  }
   0xd   : > { %2053 = sst [smem:[#allocation19_spill]] %s1551_s20  ;;  %s1131_s22 = sadd.s32 4294967294, %s1551_s20  }
   0xe   : > { %s45_s23 = sadd.s32 1, %s1547_s19  ;;  %s54_s24 = sadd.s32 1, %s1539_s17 }
   0xf   : > { %p47_p0 = scmp.ge.s32.totalorder %s45_s23, 2  ;;  %p61_p1 = scmp.ne.s32.totalorder %s1539_s17, %s1535_s16 }
  0x10   : > { %p62_p2 = scmp.eq.s32.totalorder %s1551_s20, 0  ;;  %p67_p3 = scmp.ne.s32.totalorder %s1535_s16, %s1531_s15 }
  0x11   : > { %s2085_s23 = smov (%p47_p0, %s45_s23), 0  ;;  %p68_p5 = scmp.eq.s32.totalorder %s1623_s21, 0 }
  0x12   : > { %2054 = sst [smem:[#allocation20_spill]] %s2085_s23  ;;  %p1635_p4 = por %p62_p2, %p61_p1 }
  0x13   : > { %s49_s26 = ssub.s32 %s1547_s19, %s2085_s23  ;;  %p177_p6 = scmp.eq.s32.totalorder %s1623_s21, 1 }
  0x14   : > { %p52_p7 = scmp.eq.s32.totalorder %s49_s26, 0  ;;  %p1643_p8 = por %p68_p5, %p67_p3 }
  0x15   : > { %p1647_p9 = por %p177_p6, %p61_p1  ;;  %p183_p10 = scmp.eq.s32.totalorder %s1131_s22, 1 }
  0x16   : > { %s2056_s27 = scalar_select %p1643_p8, 1, 0 }
  0x17   : > { %s2057_s28 = scalar_select %p1647_p9, 1, 0 }
  0x18   : > { %s1652_s29 = scalar_select %p52_p7, %s1539_s17, %s54_s24  }
  0x19   : > { %p1654_p11 = por %p183_p10, %p67_p3  ;;  %p1256_p13 = scmp.lt.s32.totalorder %s1551_s20, 2 }
  0x1a   : > { %2058 = sst [smem:[#allocation21_spill]] %s1652_s29  ;;  %s1661_s5 = sand.u32 1, %s1539_s17  }
  0x1b   : > { %s2059_s30 = scalar_select %p1654_p11, 1, 0 }
  0x1c   : > { %s1664_s6 = sshll.u32 %s1661_s5, 4  ;;  %s1667_s7 = sshll.u32 %s1547_s19, 8 }
  0x1d   : > { %2060 = sst [smem:[#allocation22_spill]] %s2059_s30  ;;  %p1671_p0 = pnand %p1256_p13, %p1635_p4 }
  0x1e   : > { %s225_s9 = sand.u32 1, %s1551_s20   ;;  %s2062_s1 = sld [smem:[#allocation23_spill]] }
  0x1f   : > { %s2061_s8 = scalar_select %p1671_p0, 1, 0 }
  0x20   : > { %s229_s13 = scalar_lea.vmem [#allocation8], %s1664_s6  ;;  %s1687_s22 = scalar_lea.sflag [#allocation9], %s225_s9 }
  0x21   : > { %s237_s14 = sshll.u32 %s229_s13, 4  ;;  %p1693_p4 = pneg %p1671_p0  ;;  %s1684_s14 = int_to_ptr.vmem [resolvable:$true] %s237_s14 }
  0x24   : > { %s1680_s12 = scalar_lea.hbm %s2062_s1, %s1667_s7  ;;  %s1346_s11 = scalar_lea.hbm %s2062_s1, 512 }
  0x25   : > { %s1341_s24 = scalar_lea.hbm %s1680_s12, 256  ;;  %p1347_p7 = scmp.lt.u32.totalorder %s1680_s12, %s2062_s1 }
  0x26   : > { %p1342_p3 = scmp.ne.s32.totalorder %s1680_s12, %s1341_s24  ;;  %p1348_p10 = scmp.lt.u32.totalorder %s1346_s11, %s1341_s24 }
  0x27   : > { %p1350_p12 = scmp.lt.u32.totalorder %s1341_s24, %s1680_s12 }
  0x28   : > { %p1344_p5 = pnand %p1693_p4, %p1342_p3  ;;  %p1349_p13 = por %p1348_p10, %p1347_p7 }
  0x2a   : > { %p1345_p6 = pneg %p1344_p5  ;;  %p1351_p1 = por %p1350_p12, %p1349_p13 }
  0x2c   : > { %p1352_p2 = pnand %p1351_p1, %p1345_p6 }
  0x2e   : > { %1355 = shalt.err (!%p1352_p2)
}
  0x2f   : > { %s1356_s9 = scalar_lea.vmem %s1684_s14, 256  ;;  %s1553_s26 = smov [#allocation8]  }
  0x30   : > { %p1357_p3 = scmp.ne.s32.totalorder %s1684_s14, %s1356_s9  ;;  %s1361_s10 = sshll.u32 %s1553_s26, 4  ;;  %s1362_s10 = int_to_ptr.vmem [resolvable:$false] %s1361_s10 }
  0x31   : > { %s1363_s23 = scalar_lea.vmem %s1362_s10, 512  ;;  %p1364_p9 = scmp.lt.s32.totalorder %s1684_s14, %s1362_s10 }
  0x32   : > { %p1359_p5 = pnand %p1357_p3, %p1693_p4  ;;  %p1365_p8 = scmp.lt.s32.totalorder %s1363_s23, %s1356_s9 }
  0x34   : > { %p1360_p11 = pneg %p1359_p5  ;;  %p1366_p7 = por %p1365_p8, %p1364_p9 }
  0x36   : > { %p1367_p10 = pnand %p1366_p7, %p1360_p11 }
  0x38   : > { %1370 = shalt.err (!%p1367_p10)
}
  0x39   : > { %s2042_s24 = smov 64   ;;  %s2044_s11 = smov 4  }
  0x3a   : > { %1245 = dma.hbm_to_vmem [thread:$0]  (!%p1671_p0), %s1680_s12, 256, %s1684_s14, %s1687_s22, %s2042_s24, %s2042_s24, %s2044_s11  }
  0x3b   : > { %p2064_p8 = scmp.lt.s32.totalorder %s1551_s20, 3  ;;  %p2065_p9 = scmp.ge.s32.totalorder %s1551_s20, 1 }
  0x3c   : > { %s1732_s10 = scalar_lea.hbm %s2034_s0, %s1667_s7  ;;  %s207_s23 = scalar_lea.vmem [#allocation5], %s1664_s6 }
  0x3d   : > { %p1724_p11 = pnand %p2065_p9, %p2064_p8  ;;  %s215_s1 = sshll.u32 %s207_s23, 4  ;;  %s1735_s1 = int_to_ptr.vmem [resolvable:$true] %s215_s1 }
  0x3e   : > { %s1741_s24 = scalar_lea.hbm %s2036_s2, %s1667_s7  ;;  %s204_s11 = scalar_lea.sflag [#allocation6], %s1661_s5 }
  0x3f   : > { %s2066_s13 = scalar_select %p1724_p11, 1, 0 }
  0x40   : > { %s1371_s29 = scalar_lea.hbm %s1732_s10, 256  ;;  %s1376_s17 = scalar_lea.hbm %s2034_s0, 512 }
  0x41   : > { %p1372_p12 = scmp.ne.s32.totalorder %s1732_s10, %s1371_s29  ;;  %p1377_p6 = scmp.lt.u32.totalorder %s1732_s10, %s2034_s0 }
  0x42   : > { %p1378_p13 = scmp.lt.u32.totalorder %s1376_s17, %s1371_s29  ;;  %p1380_p5 = scmp.lt.u32.totalorder %s1371_s29, %s1732_s10 }
  0x43   : > { %p1374_p1 = pnand %p1372_p12, %p1693_p4 }
  0x44   : > { %p1379_p3 = por %p1378_p13, %p1377_p6 }
  0x45   : > { %p1375_p2 = pneg %p1374_p1 }
  0x46   : > { %p1381_p7 = por %p1380_p5, %p1379_p3 }
  0x48   : > { %p1382_p10 = pnand %p1381_p7, %p1375_p2 }
  0x4a   : > { %1385 = shalt.err (!%p1382_p10)
}
  0x4b   : > { %s1386_s7 = scalar_lea.vmem %s1735_s1, 256  ;;  %s1556_s23 = smov [#allocation5]  }
  0x4c   : > { %p1387_p8 = scmp.ne.s32.totalorder %s1735_s1, %s1386_s7  ;;  %s1391_s12 = sshll.u32 %s1556_s23, 4  ;;  %s1392_s12 = int_to_ptr.vmem [resolvable:$false] %s1391_s12 }
  0x4d   : > { %s1393_s20 = scalar_lea.vmem %s1392_s12, 512  ;;  %p1394_p1 = scmp.lt.s32.totalorder %s1735_s1, %s1392_s12 }
  0x4e   : > { %p1389_p9 = pnand %p1387_p8, %p1693_p4  ;;  %p1395_p11 = scmp.lt.s32.totalorder %s1393_s20, %s1386_s7 }
  0x50   : > { %p1390_p12 = pneg %p1389_p9  ;;  %p1396_p6 = por %p1395_p11, %p1394_p1 }
  0x52   : > { %p1397_p13 = pnand %p1396_p6, %p1390_p12 }
  0x54   : > { %1400 = shalt.err (!%p1397_p13)
}
  0x55   : > { %s2067_s17 = smov 4   ;;  %s2068_s29 = smov 64  }
  0x56   : > { %1242 = dma.hbm_to_vmem [thread:$0]  (!%p1671_p0), %s1732_s10, 256, %s1735_s1, %s204_s11, %s2068_s29, %s2068_s29, %s2067_s17  }
  0x57   : > { %s251_s30 = scalar_lea.vmem [#allocation10], %s1664_s6  ;;  %s1401_s9 = scalar_lea.hbm %s1741_s24, 256 }
  0x58   : > { %s259_s14 = sshll.u32 %s251_s30, 4  ;;  %p1402_p11 = scmp.ne.s32.totalorder %s1741_s24, %s1401_s9  ;;  %s1771_s14 = int_to_ptr.vmem [resolvable:$true] %s259_s14 }
  0x59   : > { %s1406_s23 = scalar_lea.hbm %s2036_s2, 512  ;;  %p1407_p5 = scmp.lt.u32.totalorder %s1741_s24, %s2036_s2 }
  0x5a   : > { %p1404_p2 = pnand %p1402_p11, %p1693_p4  ;;  %p1408_p7 = scmp.lt.u32.totalorder %s1406_s23, %s1401_s9 }
  0x5b   : > { %p1410_p8 = scmp.lt.u32.totalorder %s1401_s9, %s1741_s24 }
  0x5c   : > { %p1405_p3 = pneg %p1404_p2  ;;  %p1409_p10 = por %p1408_p7, %p1407_p5 }
  0x5e   : > { %p1411_p9 = por %p1410_p8, %p1409_p10 }
  0x60   : > { %p1412_p12 = pnand %p1411_p9, %p1405_p3 }
  0x62   : > { %1415 = shalt.err (!%p1412_p12)
}
  0x63   : > { %s1416_s1 = scalar_lea.vmem %s1771_s14, 256  ;;  %s1557_s6 = smov [#allocation10]  }
  0x64   : > { %p1417_p1 = scmp.ne.s32.totalorder %s1771_s14, %s1416_s1  ;;  %s1421_s11 = sshll.u32 %s1557_s6, 4  ;;  %s1422_s11 = int_to_ptr.vmem [resolvable:$false] %s1421_s11 }
  0x65   : > { %s1423_s10 = scalar_lea.vmem %s1422_s11, 512  ;;  %p1424_p11 = scmp.lt.s32.totalorder %s1771_s14, %s1422_s11 }
  0x66   : > { %p1419_p6 = pnand %p1417_p1, %p1693_p4  ;;  %p1425_p2 = scmp.lt.s32.totalorder %s1423_s10, %s1416_s1 }
  0x68   : > { %p1420_p13 = pneg %p1419_p6  ;;  %p1426_p5 = por %p1425_p2, %p1424_p11 }
  0x6a   : > { %p1427_p7 = pnand %p1426_p5, %p1420_p13 }
  0x6c   : > { %1430 = shalt.err (!%p1427_p7)
}
  0x6d   : > { %1248 = dma.hbm_to_vmem [thread:$0]  (!%p1671_p0), %s1741_s24, 256, %s1771_s14, %s1687_s22, %s2068_s29, %s2068_s29, %s2067_s17  }
  0x6e   : > { %s1143_s30 = sshll.u32 %s1547_s19, 4  ;;  %s272_s9 = scalar_lea.vmem [#allocation11], %s1661_s5 }
  0x6f   : > { %s280_s26 = sshll.u32 %s272_s9, 4  ;;  %s1803_s12 = scalar_lea.hbm %s2037_s3, %s1143_s30  ;;  %s281_s26 = int_to_ptr.vmem [resolvable:$true] %s280_s26 }
  0x70   : > { %s270_s20 = scalar_lea.sflag [#allocation12], %s1661_s5  ;;  %s1431_s1 = scalar_lea.hbm %s1803_s12, 16 }
  0x71   : > { %p1432_p3 = scmp.ne.s32.totalorder %s1803_s12, %s1431_s1  ;;  %s1436_s17 = scalar_lea.hbm %s2037_s3, 32 }
  0x72   : > { %p1437_p9 = scmp.lt.u32.totalorder %s1803_s12, %s2037_s3  ;;  %p1438_p12 = scmp.lt.u32.totalorder %s1436_s17, %s1431_s1 }
  0x73   : > { %p1434_p10 = pnand %p1432_p3, %p1693_p4  ;;  %p1440_p6 = scmp.lt.u32.totalorder %s1431_s1, %s1803_s12 }
  0x74   : > { %p1439_p1 = por %p1438_p12, %p1437_p9 }
  0x75   : > { %p1435_p8 = pneg %p1434_p10 }
  0x76   : > { %p1441_p13 = por %p1440_p6, %p1439_p1 }
  0x78   : > { %p1442_p11 = pnand %p1441_p13, %p1435_p8 }
  0x7a   : > { %1445 = shalt.err (!%p1442_p11)
}
  0x7b   : > { %s1446_s5 = scalar_lea.vmem %s281_s26, 16  ;;  %s1558_s6 = smov [#allocation11]  }
  0x7c   : > { %p1447_p2 = scmp.ne.s32.totalorder %s281_s26, %s1446_s5  ;;  %s1451_s11 = sshll.u32 %s1558_s6, 4  ;;  %s1452_s11 = int_to_ptr.vmem [resolvable:$false] %s1451_s11 }
  0x7d   : > { %s1453_s10 = scalar_lea.vmem %s1452_s11, 32  ;;  %p1454_p3 = scmp.lt.s32.totalorder %s281_s26, %s1452_s11 }
  0x7e   : > { %p1449_p5 = pnand %p1447_p2, %p1693_p4  ;;  %p1455_p10 = scmp.lt.s32.totalorder %s1453_s10, %s1446_s5 }
  0x80   : > { %p1450_p7 = pneg %p1449_p5  ;;  %p1456_p0 = por %p1455_p10, %p1454_p3 }
  0x82   : > { %p1457_p9 = pnand %p1456_p0, %p1450_p7 }
  0x84   : > { %1460 = shalt.err (!%p1457_p9)
}
  0x85   : > { %p2069_p12 = scmp.ne.s32.totalorder %s2061_s8, 0  ;;  %p2070_p8 = scmp.ne.s32.totalorder %s2066_s13, 0 }
  0x86   : > { %s1826_s25 = sand.u32 (!%p2070_p8), 1, %s1535_s16   ;;  %p2071_p4 = scmp.ne.s32.totalorder (!%p2070_p8), %s2056_s27, 0 }
  0x87   : > { %1251 = dma.hbm_to_vmem [thread:$0]  (!%p2069_p12), %s1803_s12, 16, %s281_s26, %s270_s20  }
  0x88   : > { %289 = sbr.rel (%p2070_p8) target bundleno = 1098 (0x44a), region = 36  ;;  %s1145_s30 = sshll.u32 (!%p2070_p8), %s1826_s25, 4 }
  0x89   : > { %s292_s9 = scalar_lea.sflag (!%p2070_p8), [#allocation6], %s1826_s25  ;;  %s1830_s7 = scalar_lea.vmem (!%p2070_p8), [#allocation5], %s1145_s30 }
  0x8f   : > { %1514 = dma.done.wait (%p2071_p4), %s292_s9, 256  }
  0x90   : > { %1516 = vsyncadd (%p2071_p4), %s292_s9, 4294967040  ;;  %s300_s8 = sand.u32 1, %s1623_s21   ;;  %s304_s26 = scalar_lea.vmem [#allocation8], %s1145_s30 }
  0x91   : > { %s301_s13 = scalar_lea.sflag [#allocation9], %s300_s8 }
  0x92   : > { %1518 = dma.done.wait (%p2071_p4), %s301_s13, 512  }
  0x93   : > { %1520 = vsyncadd (%p2071_p4), %s301_s13, 4294966784  ;;  %s1841_s23 = scalar_lea.vmem [#allocation10], %s1145_s30  ;;  %s319_s12 = scalar_lea.sflag [#allocation12], %s1826_s25 }
  0x94   : > { %s321_s20 = scalar_lea.vmem [#allocation11], %s1826_s25 }
  0x95   : > { %1522 = dma.done.wait (%p2071_p4), %s319_s12, 16  }
  0x96   : > { %1524 = vsyncadd (%p2071_p4), %s319_s12, 4294967280  ;;  %vm374_vm0 = vcmask 64512   ;;  %v1559_v0 = vmov 0.0   ;;  %vm1560_vm1 = vmmov 0   ;;  %v383_v1 = vld [vmem:[%s304_s26] sm:$0xf] }
  0x97   : > { %1181 = vmatprep.subr.bf16.mxu0 %v1559_v0  ;;  %375 = vst.msk [vmem:[#allocation4] sm:$0xff] %vm374_vm0, %v1559_v0  ;;  %376 = vst.msk [vmem:[#allocation4 + $0x8] sm:$0xff] %vm374_vm0, %v1559_v0  ;;  %1187 = vmatprep.subr.bf16.mxu1 %v1559_v0  ;;  %v384_v2 = vld [vmem:[%s304_s26 + $0x4] sm:$0xf]  ;;  %v403_v3 = vsel %vm374_vm0, %v383_v1, 0  ;;  %vm365_vm2 = vcmask 7168  }
  0x98   : > { %377 = vst.msk [vmem:[#allocation4 + $0x10] sm:$0xff] %vm374_vm0, %v1559_v0  ;;  %378 = vst.msk [vmem:[#allocation4 + $0x18] sm:$0xff] %vm374_vm0, %v1559_v0  ;;  %1183 = vmatprep.mubr.msk.bf16.mxu0 %vm1560_vm1, %v1559_v0  ;;  %1189 = vmatprep.mubr.msk.bf16.mxu1 %vm1560_vm1, %v1559_v0  ;;  %v449_v4 = vsel %vm374_vm0, %v384_v2, 0  ;;  %v385_v5 = vld [vmem:[%s304_s26 + $0x8] sm:$0xf]  ;;  %v1561_v13 = vmov -inf  }
  0x99   : > { %1182 = vmatpush3.bf16.xpose.msra.mxu0 %v403_v3  ;;  %1188 = vmatpush3.bf16.xpose.msra.mxu1 %v449_v4  ;;  %v386_v6 = vld [vmem:[%s304_s26 + $0xc] sm:$0xf]  ;;  %v379_v7 = vld [vmem:[%s1830_s7] sm:$0xf]  ;;  %v380_v8 = vld [vmem:[%s1830_s7 + $0x4] sm:$0xf] }
  0x9a   : > { %1193 = vmatprep.subr.bf16.mxu0 %v1559_v0  ;;  %1199 = vmatprep.subr.bf16.mxu1 %v1559_v0  ;;  %v495_v9 = vsel %vm374_vm0, %v385_v5, 0  ;;  %v541_v10 = vsel %vm374_vm0, %v386_v6, 0  ;;  %v381_v11 = vld [vmem:[%s1830_s7 + $0x8] sm:$0xf]  ;;  %v382_v12 = vld [vmem:[%s1830_s7 + $0xc] sm:$0xf] }
  0x9b   : > { %366 = vst.msk [vmem:[#allocation2] sm:$0xff] %vm365_vm2, %v1561_v13  ;;  %367 = vst.msk [vmem:[#allocation2 + $0x8] sm:$0xff] %vm365_vm2, %v1561_v13  ;;  %v1149_v14 = vld [vmem:[%s321_s20] ss:$0 sm:$0xff]  ;;  %v1562_v39 = vmov 0   ;;  %vm711_vm3 = vcmask 1043456  }
  0x9c   : > { %368 = vst.msk [vmem:[#allocation2 + $0x10] sm:$0xff] %vm365_vm2, %v1561_v13  ;;  %369 = vst.msk [vmem:[#allocation2 + $0x18] sm:$0xff] %vm365_vm2, %v1561_v13  ;;  %1315 = vset.pattern.permute.xlu0 %v1562_v39  ;;  %1316 = vset.pattern.permute.xlu1 %v1562_v39  ;;  %v387_v56 = vld [vmem:[%s1841_s23] sm:$0xf]  ;;  %v388_v58 = vld [vmem:[%s1841_s23 + $0x4] sm:$0xf] }
  0x9d   : > { %370 = vst.msk [vmem:[#allocation3] sm:$0xff] %vm365_vm2, %v1559_v0  ;;  %371 = vst.msk [vmem:[#allocation3 + $0x8] sm:$0xff] %vm365_vm2, %v1559_v0  ;;  %v713_v57 = vsel %vm711_vm3, %v387_v56, 0  ;;  %v759_v59 = vsel %vm711_vm3, %v388_v58, 0  ;;  %v390_v13 = vld [vmem:[%s1841_s23 + $0xc] sm:$0xf] }
  0x9e   : > { %372 = vst.msk [vmem:[#allocation3 + $0x10] sm:$0xff] %vm365_vm2, %v1559_v0  ;;  %373 = vst.msk [vmem:[#allocation3 + $0x18] sm:$0xff] %vm365_vm2, %v1559_v0  ;;  %v677_v56 = vld [vmem:[#allocation4 + $0x8] sm:$0xff]  ;;  %s1563_s21 = smov 8   ;;  %s1564_s27 = smov 16   ;;  %vm957_vm4 = vcmask 130048  }
  0x9f   : > { %s1565_s1 = smov 24   ;;  %s1148_s22 = sshll.u32 %s1826_s25, 3  ;;  %vm959_vm5 = vcmask 195584   ;;  %vm961_vm6 = vcmask 261120  }
  0xa0   : > { %1184 = vmatmul.mubr.msk.bf16.vlgmr.msra.gmra.mrb[0].mxu0 %vm374_vm0, %v379_v7  ;;  %1190 = vmatmul.mubr.msk.bf16.vlgmr.msra.gmra.mrb[0].mxu1 %vm374_vm0, %v380_v8  ;;  %v389_v8 = vld [vmem:[%s1841_s23 + $0x8] sm:$0xf]  ;;  %s1159_s24 = sshll.u32 %s1543_s18, 7  ;;  %s359_s17 = scalar_lea.vmem [#allocation13], %s1148_s22 }
  0xa1   : > { %1194 = vmatpush3.bf16.xpose.msra.mxu0 %v495_v9  ;;  %1200 = vmatpush3.bf16.xpose.msra.mxu1 %v541_v10  ;;  %s978_s29 = sshll.u32 %s359_s17, 4  ;;  %s1985_s6 = scalar_lea.hbm %s2038_s4, %s1159_s24  ;;  %s1987_s29 = int_to_ptr.vmem [resolvable:$true] %s978_s29 }
  0xa2   : > { %1195 = vmatprep.mubr.msk.bf16.mxu0 %vm1560_vm1, %v1559_v0  ;;  %1201 = vmatprep.mubr.msk.bf16.mxu1 %vm1560_vm1, %v1559_v0  ;;  %v1911_v40 = vld [vmem:[#allocation2] sm:$0xff]  ;;  %v1916_v43 = vld [vmem:[#allocation2 + $0x8] sm:$0xff]  ;;  %s964_s18 = scalar_lea.sflag [#allocation7], %s1826_s25  ;;  %s1461_s11 = scalar_lea.vmem %s1987_s29, 128 }
  0xa3   : > { %1205 = vmatprep.subr.bf16.mxu0 %v1559_v0  ;;  %1211 = vmatprep.subr.bf16.mxu1 %v1559_v0  ;;  %v1926_v47 = vld [vmem:[#allocation2 + $0x10] sm:$0xff]  ;;  %v1934_v51 = vld [vmem:[#allocation2 + $0x18] sm:$0xff]  ;;  %p1462_p0 = scmp.ne.s32.totalorder %s1987_s29, %s1461_s11  ;;  %p2072_p1 = scmp.ne.s32.totalorder %s2057_s28, 0 }
  0xa4   : > { %s1566_s10 = smov [#allocation13]  }
  0xa5   : > { %p1463_p6 = pnand %p1462_p0, %p2072_p1  ;;  %s1465_s30 = sshll.u32 %s1566_s10, 4  ;;  %s1466_s30 = int_to_ptr.vmem [resolvable:$false] %s1465_s30 }
  0xa6   : > { %s1467_s9 = scalar_lea.vmem %s1466_s30, 256  ;;  %p1468_p11 = scmp.lt.s32.totalorder %s1987_s29, %s1466_s30 }
  0xa7   : > { %p1464_p13 = pneg %p1463_p6  ;;  %p1469_p2 = scmp.lt.s32.totalorder %s1467_s9, %s1461_s11 }
  0xa8   : > { %1196 = vmatmul.mubr.msk.bf16.vlgmr.msra.gmra.mrb[4].mxu0 %vm374_vm0, %v381_v11  ;;  %1202 = vmatmul.mubr.msk.bf16.vlgmr.msra.gmra.mrb[4].mxu1 %vm374_vm0, %v382_v12  ;;  %v805_v12 = vsel %vm711_vm3, %v389_v8, 0  ;;  %v679_v8 = vld [vmem:[#allocation4 + $0x18] sm:$0xff] }
  0xa9   : > { %1207 = vmatprep.mubr.msk.bf16.mxu0 %vm1560_vm1, %v1559_v0  ;;  %1213 = vmatprep.mubr.msk.bf16.mxu1 %vm1560_vm1, %v1559_v0  ;;  %p1470_p5 = por %p1469_p2, %p1468_p11 }
  0xaa   : > { %1206 = vmatpush3.bf16.msra.mxu0 %v713_v57  ;;  %1212 = vmatpush3.bf16.msra.mxu1 %v759_v59 }
  0xab   : > { %1217 = vmatprep.subr.bf16.mxu0 %v1559_v0  ;;  %1223 = vmatprep.subr.bf16.mxu1 %v1559_v0  ;;  %p1471_p7 = pnand %p1470_p5, %p1464_p13 }
 0x173   : > { %v439_v15 = vpop.f32.mrb[0].mxu0  ;;  %v485_v16 = vpop.f32.mrb[0].mxu1 }
 0x174   : > { %v1901_v17 = vadd.f32 %v1149_v14, %v439_v15  ;;  %v1185_v18 = vpop.f32.mrb[1].mxu0  ;;  %v1903_v19 = vadd.f32 %v1149_v14, %v485_v16  ;;  %v1191_v20 = vpop.f32.mrb[1].mxu1 }
 0x175   : > { %v442_v21 = vpop.f32.mrb[2].mxu0  ;;  %v488_v22 = vpop.f32.mrb[2].mxu1 }
 0x176   : > { %v1186_v23 = vpop.f32.mrb[3].mxu0  ;;  %v587_v24 = vsel %vm374_vm0, %v1901_v17, -inf  ;;  %v1192_v25 = vpop.f32.mrb[3].mxu1  ;;  %v590_v26 = vsel %vm374_vm0, %v1903_v19, -inf }
 0x177   : > { %588 = vmax.xlane.f32.xlu0 %v587_v24 }
 0x17b   : > { %591 = vmax.xlane.f32.xlu0 %v590_v26  ;;  %v531_v27 = vpop.f32.mrb[4].mxu0  ;;  %v577_v28 = vpop.f32.mrb[4].mxu1 }
 0x17c   : > { %v532_v29 = vadd.f32 %v1149_v14, %v531_v27  ;;  %v1197_v30 = vpop.f32.mrb[5].mxu0  ;;  %v578_v31 = vadd.f32 %v1149_v14, %v577_v28  ;;  %v1203_v32 = vpop.f32.mrb[5].mxu1 }
 0x17d   : > { %v534_v33 = vpop.f32.mrb[6].mxu0  ;;  %v580_v34 = vpop.f32.mrb[6].mxu1 }
 0x17e   : > { %v1198_v35 = vpop.f32.mrb[7].mxu0  ;;  %v593_v36 = vsel %vm374_vm0, %v532_v29, -inf  ;;  %v1204_v37 = vpop.f32.mrb[7].mxu1  ;;  %v596_v38 = vsel %vm374_vm0, %v578_v31, -inf  ;;  %v649_v34 = vld [vmem:[#allocation3 + $0x10] sm:$0xff] }
 0x17f   : > { %594 = vmax.xlane.f32.xlu1 %v593_v36 }
 0x183   : > { %597 = vmax.xlane.f32.xlu1 %v596_v38  ;;  %v650_v38 = vld [vmem:[#allocation3 + $0x18] sm:$0xff] }
 0x204   : > { %v589_v41 = vpop.xlane.xlu0 %588 }
 0x205   : > { %v1914_v42 = vmax.f32 %v1911_v40, %v589_v41 }
 0x207   : > { %v603_v44 = vsub.f32 %v1911_v40, %v1914_v42  ;;  %901 = vst.msk [vmem:[#allocation2] sm:$0xff] %vm365_vm2, %v1914_v42  ;;  %617 = vperm.xlu0 %1315, %v1914_v42  }
 0x208   : > { %v592_v45 = vpop.xlane.xlu0 %591 }
 0x209   : > { %v1924_v46 = vmax.f32 %v1916_v43, %v592_v45  ;;  %v607_v30 = vmul.f32 1.442695, %v603_v44 }
 0x20b   : > { %v604_v48 = vsub.f32 %v1916_v43, %v1924_v46  ;;  %902 = vst.msk [vmem:[#allocation2 + $0x8] sm:$0xff] %vm365_vm2, %v1924_v46  ;;  %622 = vperm.xlu1 %1316, %v1924_v46   ;;  %v647_v46 = vld [vmem:[#allocation3] sm:$0xff] }
 0x20c   : > { %v595_v49 = vpop.xlane.xlu1 %594 }
 0x20d   : > { %v601_v50 = vmax.f32 %v1926_v47, %v595_v49 }
 0x20f   : > { %v605_v52 = vsub.f32 %v1926_v47, %v601_v50  ;;  %903 = vst.msk [vmem:[#allocation2 + $0x10] sm:$0xff] %vm365_vm2, %v601_v50  ;;  %627 = vperm.xlu1 %1316, %v601_v50  }
 0x210   : > { %v598_v53 = vpop.xlane.xlu1 %597 }
 0x211   : > { %v602_v54 = vmax.f32 %v1934_v51, %v598_v53  ;;  %v611_v24 = vmul.f32 1.442695, %v605_v52 }
 0x213   : > { %v606_v55 = vsub.f32 %v1934_v51, %v602_v54  ;;  %904 = vst.msk [vmem:[#allocation2 + $0x18] sm:$0xff] %vm365_vm2, %v602_v54  ;;  %632 = vperm.xlu1 %1316, %v602_v54  }
 0x215   : > { %v613_v26 = vmul.f32 1.442695, %v606_v55 }
 0x286   : > { %v618_v60 = vpop.permute.xlu0 %617 }
 0x287   : > { %v635_v61 = vsub.f32 %v1901_v17, %v618_v60  ;;  %v851_v17 = vsel %vm711_vm3, %v390_v13, 0 }
 0x289   : > { %v639_v62 = vmul.f32 1.442695, %v635_v61 }
 0x28a   : > { %v623_v63 = vpop.permute.xlu1 %622 }
 0x28b   : > { %1317 = vpow2.f32 %v639_v62  ;;  %v636_v1 = vsub.f32 %v1903_v19, %v623_v63  ;;  %v678_v63 = vld [vmem:[#allocation4 + $0x10] sm:$0xff] }
 0x28d   : > { %v641_v2 = vmul.f32 1.442695, %v636_v1 }
 0x28e   : > { %v628_v3 = vpop.permute.xlu1 %627 }
 0x28f   : > { %1319 = vpow2.f32 %v641_v2  ;;  %v637_v4 = vsub.f32 %v532_v29, %v628_v3 }
 0x291   : > { %v643_v5 = vmul.f32 1.442695, %v637_v4 }
 0x292   : > { %v633_v6 = vpop.permute.xlu1 %632 }
 0x293   : > { %1321 = vpow2.f32 %v643_v5  ;;  %v638_v7 = vsub.f32 %v578_v31, %v633_v6  ;;  %v648_v31 = vld [vmem:[#allocation3 + $0x8] sm:$0xff] }
 0x295   : > { %v1318_v9 = vpop.eup %1317  ;;  %v645_v10 = vmul.f32 1.442695, %v638_v7 }
 0x296   : > { %v704_v11 = vpack.c.bf16 %v1318_v9, %v1318_v9  ;;  %v655_v25 = vsel %vm374_vm0, %v1318_v9, 0.0 }
 0x297   : > { %1323 = vpow2.f32 %v645_v10 }
 0x298   : > { %1208 = vmatmul.mubr.msk.bf16.vlgmr.msra.gmra.mrb[8].mxu0 %vm374_vm0, %v704_v11  ;;  %1325 = vpow2.f32 %v611_v24 }
 0x299   : > { %v1320_v14 = vpop.eup %1319  ;;  %1218 = vmatpush3.bf16.msra.mxu0 %v805_v12  ;;  %1219 = vmatprep.mubr.msk.bf16.mxu0 %vm1560_vm1, %v1559_v0 }
 0x29a   : > { %v658_v15 = vsel %vm374_vm0, %v1320_v14, 0.0  ;;  %v705_v16 = vpack.c.bf16 %v1320_v14, %v1320_v14 }
 0x29b   : > { %659 = vadd.xlane.f32.xlu1 %v658_v15 }
 0x29c   : > { %1214 = vmatmul.mubr.msk.bf16.vlgmr.msra.gmra.mrb[8].mxu1 %vm374_vm0, %v705_v16 }
 0x29d   : > { %v1322_v18 = vpop.eup %1321  ;;  %1224 = vmatpush3.bf16.msra.mxu1 %v851_v17  ;;  %1225 = vmatprep.mubr.msk.bf16.mxu1 %vm1560_vm1, %v1559_v0  ;;  %v609_v0 = vmul.f32 1.442695, %v604_v48 }
 0x29e   : > { %v661_v19 = vsel %vm374_vm0, %v1322_v18, 0.0  ;;  %v706_v20 = vpack.c.bf16 %v1322_v18, %v1322_v18 }
 0x29f   : > { %662 = vadd.xlane.f32.xlu0 %v661_v19  ;;  %1327 = vpow2.f32 %v609_v0 }
 0x2a0   : > { %1220 = vmatmul.mubr.msk.bf16.vlgmr.msra.gmra.mrb[12].mxu0 %vm374_vm0, %v706_v20  ;;  %1329 = vpow2.f32 %v613_v26  ;;  %v676_v26 = vld [vmem:[#allocation4] sm:$0xff] }
 0x2a1   : > { %v1324_v21 = vpop.eup %1323  ;;  %1331 = vpow2.f32 %v607_v30 }
 0x2a2   : > { %v664_v22 = vsel %vm374_vm0, %v1324_v21, 0.0  ;;  %v707_v23 = vpack.c.bf16 %v1324_v21, %v1324_v21  ;;  %v1326_v27 = vpop.eup %1325 }
 0x2a3   : > { %665 = vadd.xlane.f32.xlu1 %v664_v22  ;;  %v653_v36 = vmul.f32 %v1326_v27, %v649_v34 }
 0x2a4   : > { %1226 = vmatmul.mubr.msk.bf16.vlgmr.msra.gmra.mrb[12].mxu1 %vm374_vm0, %v707_v23 }
 0x2a7   : > { %656 = vadd.xlane.f32.xlu1 %v655_v25 }
 0x2a9   : > { %v1328_v28 = vpop.eup %1327 }
 0x2aa   : > { %v1330_v29 = vpop.eup %1329  ;;  %v652_v32 = vmul.f32 %v1328_v28, %v648_v31 }
 0x2ab   : > { %v654_v41 = vmul.f32 %v1330_v29, %v650_v38  ;;  %v1332_v43 = vpop.eup %1331 }
 0x2ac   : > { %v651_v44 = vmul.f32 %v1332_v43, %v647_v46 }
 0x2b5   : > { %692 = vperm.xlu0 %1315, %v1326_v27  }
 0x2b8   : > { %687 = vperm.xlu1 %1316, %v1328_v28  }
 0x2bc   : > { %697 = vperm.xlu1 %1316, %v1330_v29  }
 0x328   : > { %v660_v33 = vpop.xlane.xlu1 %659 }
 0x329   : > { %v668_v35 = vadd.f32 %v660_v33, %v652_v32 }
 0x32b   : > { %673 = vst.msk [vmem:[#allocation3 + $0x8] sm:$0xff] %vm365_vm2, %v668_v35 }
 0x32c   : > { %v663_v37 = vpop.xlane.xlu0 %662 }
 0x32d   : > { %v669_v39 = vadd.f32 %v663_v37, %v653_v36 }
 0x32f   : > { %674 = vst.msk [vmem:[#allocation3 + $0x10] sm:$0xff] %vm365_vm2, %v669_v39 }
 0x330   : > { %v666_v45 = vpop.xlane.xlu1 %665 }
 0x331   : > { %v670_v40 = vadd.f32 %v666_v45, %v654_v41 }
 0x332   : > { %v913_v42 = vld [vmem:[#allocation3 + $0x8] sm:$0xff] }
 0x333   : > { %675 = vst.msk [vmem:[#allocation3 + $0x18] sm:$0xff] %vm365_vm2, %v670_v40  ;;  %1333 = vrcp.f32 %v913_v42 }
 0x334   : > { %v657_v47 = vpop.xlane.xlu1 %656  ;;  %v693_v1 = vpop.permute.xlu0 %692 }
 0x335   : > { %v667_v48 = vadd.f32 %v657_v47, %v651_v44  ;;  %v702_v6 = vmul.f32 %v693_v1, %v678_v63 }
 0x336   : > { %v914_v49 = vld [vmem:[#allocation3 + $0x10] sm:$0xff] }
 0x337   : > { %672 = vst.msk [vmem:[#allocation3] sm:$0xff] %vm365_vm2, %v667_v48  ;;  %1335 = vrcp.f32 %v914_v49 }
 0x338   : > { %v688_v57 = vpop.permute.xlu1 %687 }
 0x339   : > { %v701_v61 = vmul.f32 %v688_v57, %v677_v56 }
 0x33a   : > { %v915_v50 = vld [vmem:[#allocation3 + $0x18] sm:$0xff] }
 0x33b   : > { %1337 = vrcp.f32 %v915_v50 }
 0x33c   : > { %v698_v9 = vpop.permute.xlu1 %697 }
 0x33d   : > { %v1334_v51 = vpop.eup %1333  ;;  %v703_v14 = vmul.f32 %v698_v9, %v679_v8 }
 0x33e   : > { %927 = vperm.xlu1 %1316, %v1334_v51   ;;  %v912_v52 = vld [vmem:[#allocation3] sm:$0xff] }
 0x33f   : > { %1339 = vrcp.f32 %v912_v52 }
 0x341   : > { %v1336_v53 = vpop.eup %1335 }
 0x342   : > { %932 = vperm.xlu1 %1316, %v1336_v53  }
 0x345   : > { %v1338_v54 = vpop.eup %1337 }
 0x346   : > { %937 = vperm.xlu0 %1315, %v1338_v54   ;;  %682 = vperm.xlu1 %1316, %v1332_v43  }
 0x349   : > { %v1340_v55 = vpop.eup %1339 }
 0x34a   : > { %922 = vperm.xlu0 %1315, %v1340_v55  }
 0x36b   : > { %v749_v58 = vpop.f32.mrb[8].mxu0 }
 0x36c   : > { %v1209_v59 = vpop.f32.mrb[9].mxu0 }
 0x36d   : > { %v752_v60 = vpop.f32.mrb[10].mxu0 }
 0x36e   : > { %v1210_v62 = vpop.f32.mrb[11].mxu0 }
 0x36f   : > { %v795_v2 = vpop.f32.mrb[8].mxu1 }
 0x370   : > { %v894_v3 = vadd.f32 %v795_v2, %v701_v61  ;;  %v1215_v4 = vpop.f32.mrb[9].mxu1 }
 0x371   : > { %v798_v5 = vpop.f32.mrb[10].mxu1 }
 0x372   : > { %898 = vst.msk [vmem:[#allocation4 + $0x8] sm:$0xff] %vm374_vm0, %v894_v3  ;;  %v1216_v7 = vpop.f32.mrb[11].mxu1 }
 0x373   : > { %v841_v10 = vpop.f32.mrb[12].mxu0 }
 0x374   : > { %v895_v11 = vadd.f32 %v841_v10, %v702_v6  ;;  %v1221_v12 = vpop.f32.mrb[13].mxu0 }
 0x375   : > { %v844_v13 = vpop.f32.mrb[14].mxu0 }
 0x376   : > { %899 = vst.msk [vmem:[#allocation4 + $0x10] sm:$0xff] %vm374_vm0, %v895_v11  ;;  %v1222_v15 = vpop.f32.mrb[15].mxu0 }
 0x377   : > { %v887_v16 = vpop.f32.mrb[12].mxu1 }
 0x378   : > { %v896_v17 = vadd.f32 %v887_v16, %v703_v14  ;;  %v1227_v18 = vpop.f32.mrb[13].mxu1 }
 0x379   : > { %v890_v19 = vpop.f32.mrb[14].mxu1  ;;  %v909_v21 = vld [vmem:[#allocation4 + $0x8] sm:$0xff] }
 0x37a   : > { %900 = vst.msk [vmem:[#allocation4 + $0x18] sm:$0xff] %vm374_vm0, %v896_v17  ;;  %v1228_v20 = vpop.f32.mrb[15].mxu1 }
 0x37d   : > { %v910_v25 = vld [vmem:[#allocation4 + $0x10] sm:$0xff] }
 0x381   : > { %v911_v27 = vld [vmem:[#allocation4 + $0x18] sm:$0xff] }
 0x3bd   : > { %v928_v22 = vpop.permute.xlu1 %927 }
 0x3be   : > { %v941_v23 = vmul.f32 %v928_v22, %v909_v21 }
 0x3c0   : > { %945 = vrot.lane.b32.xlu1 %v941_v23, %s1563_s21 }
 0x3c1   : > { %v933_v24 = vpop.permute.xlu1 %932 }
 0x3c2   : > { %v942_v0 = vmul.f32 %v933_v24, %v910_v25 }
 0x3c4   : > { %949 = vrot.lane.b32.xlu0 %v942_v0, %s1564_s27 }
 0x3c5   : > { %v938_v28 = vpop.permute.xlu0 %937  ;;  %v683_v29 = vpop.permute.xlu1 %682 }
 0x3c6   : > { %v943_v30 = vmul.f32 %v938_v28, %v911_v27  ;;  %v700_v31 = vmul.f32 %v683_v29, %v676_v26 }
 0x3c8   : > { %v893_v32 = vadd.f32 %v749_v58, %v700_v31  ;;  %953 = vrot.lane.b32.xlu1 %v943_v30, %s1565_s1 }
 0x3c9   : > { %v923_v33 = vpop.permute.xlu0 %922 }
 0x3ca   : > { %897 = vst.msk [vmem:[#allocation4] sm:$0xff] %vm374_vm0, %v893_v32 }
 0x3d1   : > { %v908_v34 = vld [vmem:[#allocation4] sm:$0xff] }
 0x3d2   : > { %v940_v36 = vmul.f32 %v923_v33, %v908_v34 }
 0x432   : > { %v946_v35 = vpop.permute.xlu1 %945 }
 0x433   : > { %v956_v38 = vsel %vm374_vm0, %v940_v36, %v946_v35 }
 0x436   : > { %v950_v37 = vpop.permute.xlu0 %949 }
 0x437   : > { %v958_v39 = vsel %vm957_vm4, %v956_v38, %v950_v37 }
 0x43a   : > { %v954_v41 = vpop.permute.xlu1 %953 }
 0x43b   : > { %v960_v43 = vsel %vm959_vm5, %v958_v39, %v954_v41 }
 0x43c   : > { %962 = vst.msk [vmem:[%s359_s17] sm:$0xff] %vm961_vm6, %v960_v43 }
 0x43d   : > { %1474 = shalt.err (!%p1471_p7)
}
 0x43e   : > { %s1475_s25 = scalar_lea.hbm %s1985_s6, 128  ;;  %s1479_s13 = scalar_lea.hbm %s2038_s4, 256 }
 0x43f   : > { %p1476_p3 = scmp.ne.s32.totalorder %s1985_s6, %s1475_s25  ;;  %p1480_p12 = scmp.lt.u32.totalorder %s1985_s6, %s2038_s4 }
 0x440   : > { %p1481_p8 = scmp.lt.u32.totalorder %s1479_s13, %s1475_s25  ;;  %p1483_p0 = scmp.lt.u32.totalorder %s1475_s25, %s1985_s6 }
 0x441   : > { %p1477_p10 = pnand %p1476_p3, %p2072_p1 }
 0x442   : > { %p1482_p4 = por %p1481_p8, %p1480_p12 }
 0x443   : > { %p1478_p9 = pneg %p1477_p10 }
 0x444   : > { %p1484_p6 = por %p1483_p0, %p1482_p4 }
 0x446   : > { %p1485_p13 = pnand %p1484_p6, %p1478_p9 }
 0x448   : > { %1488 = shalt.err (!%p1485_p13)
}
 0x449   : > { %1237 = dma.vmem_to_hbm [thread:$0]  (%p2072_p1), %s1987_s29, 128, %s1985_s6, %s964_s18  }
 0x44a PF: > { %s2073_s12 = sld [smem:[#allocation22_spill]]  ;;  %s2074_s20 = sld [smem:[#allocation19_spill]] }
 0x44b   : > { %s990_s21 = sand.u32 1, %s1531_s15  }
 0x44c   : > { %s991_s27 = scalar_lea.sflag [#allocation7], %s990_s21 }
 0x450   : > { %p2075_p11 = scmp.ne.s32.totalorder %s2073_s12, 0  ;;  %p2076_p2 = scmp.ge.s32.totalorder %s2074_s20, 2 }
 0x452   : > { %p1253_p5 = pnand %p2076_p2, %p2075_p11 }
 0x454   : > { %1526 = dma.done.wait (!%p1253_p5), %s991_s27, 128  }
 0x455   : > { %1528 = vsyncadd (!%p1253_p5), %s991_s27, 4294967168  ;;  %s26_s20 = sadd.s32 1, %s2074_s20   ;;  %s2077_s1 = sld [smem:[#allocation18_spill]] }
 0x456   : > { %p23_p7 = scmp.ge.s32.totalorder %s26_s20, 4   ;;  %s2078_s17 = sld [smem:[#allocation21_spill]] }
 0x457   : > { %s2079_s28 = sld [smem:[#allocation20_spill]]  ;;  %s2080_s15 = smov %s1535_s16 }
 0x458   : > { %s2082_s18 = smov %s1547_s19  ;;  %25 = sbr.rel (!%p23_p7) target bundleno = 12 (0xc), region = 126 }
 0x45b   : > { %s2081_s16 = smov %s2077_s1 }
 0x45d   : > { %s2083_s19 = smov %s2079_s28 }
 0x45f   :  { %996 = vsyncpa [#allocation6], 1 }
 0x460   :  { %998 = vsyncpa [#allocation6 + $0x1], 1 }
 0x461   :  { %999 = vsyncpa [#allocation9], 1 }
 0x462   :  { %1001 = vsyncpa [#allocation9 + $0x1], 1 }
 0x463   :  { %1002 = vsyncpa [#allocation12], 1 }
 0x464   :  { %1004 = vsyncpa [#allocation12 + $0x1], 1 }
 0x465   :  { %1005 = vsyncpa [#allocation7], 1 }
 0x466   :  { %1007 = vsyncpa [#allocation7 + $0x1], 1 }

</bundles_post_ra>
